<compile_context>
chip_gen: v5e
topology: v5e:2x2
jax: 0.10.0
libtpu: 0.0.40
codegen_flags: <defaults>
</compile_context>

<pallas_src>
import functools
import math

import jax
import jax.numpy as jnp
from jax.experimental import pallas as pl
from jax.experimental.pallas import tpu as pltpu

ALPHA = 1.0
GAMMA = 0.3
SMOOTH = 1.0

_LANE = 128
_CHUNK = 512        # inner accumulation chunk (lanes); multiple of 128
_TD_MAX = 32768     # max feature-tile width per grid step (lanes)
_PAD_LOGIT = -1e4   # sigmoid/BCE of this are exactly 0 in f32


def _round_up(x, m):
    return ((x + m - 1) // m) * m


def _fold128(v):
    """(R, k*128) -> (R, 128): pairwise tree-sum of aligned 128-lane slices
    (VPU adds only; the lanes->scalar reduce happens once in the wrapper)."""
    k = v.shape[1] // _LANE
    chunks = [v[:, c * _LANE:(c + 1) * _LANE] for c in range(k)]
    while len(chunks) > 1:
        nxt = [chunks[i] + chunks[i + 1] for i in range(0, len(chunks) - 1, 2)]
        if len(chunks) % 2:
            nxt.append(chunks[-1])
        chunks = nxt
    return chunks[0]


def _partials_kernel(x_ref, t_ref, inter_ref, m1_ref, m2_ref, bce_ref, *,
                     d, td, chunk, unroll, mask_last):
    j = pl.program_id(1)

    @pl.when(j == 0)
    def _():
        inter_ref[...] = jnp.zeros_like(inter_ref)
        m1_ref[...] = jnp.zeros_like(m1_ref)
        m2_ref[...] = jnp.zeros_like(m2_ref)
        bce_ref[...] = jnp.zeros_like(bce_ref)

    rows = x_ref.shape[0]
    steps = td // chunk

    def tile_sums(apply_mask):
        col0 = j * td

        def body(c, carry):
            ia, m1a, m2a, ba = carry
            off = pl.multiple_of(c * chunk, chunk)
            x = x_ref[:, pl.ds(off, chunk)].astype(jnp.float32)
            t = t_ref[:, pl.ds(off, chunk)].astype(jnp.float32)
            if apply_mask:
                lane = jax.lax.broadcasted_iota(jnp.int32, (rows, chunk), 1)
                valid = (col0 + off + lane) < d
                x = jnp.where(valid, x, _PAD_LOGIT)
                t = jnp.where(valid, t, 0.0)
            # One exp per element, shared by sigmoid and the stable BCE softplus.
            e = jnp.exp(-jnp.abs(x))
            inv = pl.reciprocal(1.0 + e, approx=False)
            probs = jnp.where(x >= 0.0, inv, e * inv)          # sigmoid(x)
            bce = jnp.maximum(x, 0.0) - x * t + jnp.log1p(e)   # stable BCE-with-logits
            return (ia + _fold128(probs * t),
                    m1a + _fold128(probs),
                    m2a + _fold128(t),
                    ba + _fold128(bce))

        zero = jnp.zeros((rows, _LANE), jnp.float32)
        ia, m1a, m2a, ba = jax.lax.fori_loop(
            0, steps, body, (zero, zero, zero, zero), unroll=unroll)
        inter_ref[...] += ia
        m1_ref[...] += m1a
        m2_ref[...] += m2a
        bce_ref[...] += ba

    if mask_last:
        last = pl.num_programs(1) - 1

        @pl.when(j == last)       # ragged last D-tile: masked path
        def _():
            tile_sums(True)

        @pl.when(j != last)       # interior tiles: unmasked fast path
        def _():
            tile_sums(False)
    else:
        tile_sums(False)


@jax.jit
def soft_dice_loss(logits, targets):
    """logits, targets: (N, C, H, W) arrays. Returns scalar f32 loss."""
    n = logits.shape[0]
    d = math.prod(logits.shape[1:])

    # Flatten only (no HBM copy). No pad / cast passes: ragged tiles are masked
    # in-kernel and targets are read in their native dtype.
    x2 = logits.reshape(n, d)
    t2 = targets.reshape(n, d)

    d_k = d
    if d_k < _LANE:
        # Degenerate tiny-feature case only; one-off pad on a microscopic tensor.
        x2 = jnp.pad(x2, ((0, 0), (0, _LANE - d_k)), constant_values=_PAD_LOGIT)
        t2 = jnp.pad(t2, ((0, 0), (0, _LANE - d_k)))
        d_k = _LANE

    # Tile width: multiple of `chunk`, <= d_k (never wider than the array),
    # balanced across the tile count so the masked tail is as small as possible.
    chunk = _CHUNK if d_k >= _CHUNK else _LANE
    cap = (d_k // chunk) * chunk
    nj = pl.cdiv(d_k, _TD_MAX)
    td = min(_round_up(pl.cdiv(d_k, nj), chunk), cap)
    nj = pl.cdiv(d_k, td)
    td = min(_round_up(pl.cdiv(d_k, nj), chunk), cap)
    nj = pl.cdiv(d_k, td)
    mask_last = (d_k % td) != 0

    # Row block: full batch when small (block dim == array dim is exempt from
    # the 8-divisibility rule), otherwise 8-row blocks.
    n_blk = n if n < 8 else 8
    n_rb = pl.cdiv(n, n_blk)
    out_rows = n_rb * n_blk

    kernel = functools.partial(
        _partials_kernel, d=d_k, td=td, chunk=chunk,
        unroll=min(4, max(td // chunk, 1)), mask_last=mask_last)

    in_spec = pl.BlockSpec((n_blk, td), lambda i, j: (i, j))
    row_out = pl.BlockSpec((n_blk, _LANE), lambda i, j: (i, 0))

    # Scoped VMEM: double-buffered x+t blocks plus headroom, capped at 32 MiB.
    blk_bytes = n_blk * td * (x2.dtype.itemsize + t2.dtype.itemsize)
    vmem_limit = int(min(32 * 1024 * 1024,
                         max(16 * 1024 * 1024, 2 * blk_bytes + 8 * 1024 * 1024)))

    cost = pl.CostEstimate(
        flops=15 * n * d_k,
        transcendentals=3 * n * d_k,
        bytes_accessed=int(x2.size * x2.dtype.itemsize
                           + t2.size * t2.dtype.itemsize
                           + 4 * out_rows * _LANE * 4))

    inter_p, m1_p, m2_p, bce_p = pl.pallas_call(
        kernel,
        out_shape=tuple(
            jax.ShapeDtypeStruct((out_rows, _LANE), jnp.float32) for _ in range(4)),
        grid_spec=pltpu.PrefetchScalarGridSpec(
            num_scalar_prefetch=0,
            grid=(n_rb, nj),
            in_specs=[in_spec, in_spec],
            out_specs=[row_out, row_out, row_out, row_out],
        ),
        compiler_params=pltpu.CompilerParams(
            dimension_semantics=("parallel", "arbitrary"),
            vmem_limit_bytes=vmem_limit),
        cost_estimate=cost,
    )(x2, t2)

    # Final lanes->scalar reductions + dice/focal math: O(N*128) work, in JAX.
    inter = jnp.sum(inter_p[:n], axis=1)
    m1s = jnp.sum(m1_p[:n], axis=1)
    m2s = jnp.sum(m2_p[:n], axis=1)
    bce_sum = jnp.sum(bce_p[:n])

    score = (2.0 * inter + SMOOTH) / (m1s + m2s + SMOOTH)
    dice = 1.0 - jnp.sum(score) / n
    ce = bce_sum / (n * d)                                   # mean BCE over true elems
    fc = ALPHA * (1.0 - jnp.exp(-ce)) ** GAMMA * ce          # focal term
    return (dice + fc) * 0.5


def _reference(logits, targets):
    # pure-JAX reference of the PyTorch forward, for sanity checking
    n = logits.shape[0]
    probs = jax.nn.sigmoid(logits)
    m1 = probs.reshape(n, -1)
    m2 = targets.reshape(n, -1)
    inter = jnp.sum(m1 * m2, axis=1)
    score = (2.0 * inter + 1.0) / (jnp.sum(m1, axis=1) + jnp.sum(m2, axis=1) + 1.0)
    score = 1.0 - jnp.sum(score) / n
    x = logits
    t = targets
    bce = jnp.maximum(x, 0.0) - x * t + jnp.log1p(jnp.exp(-jnp.abs(x)))
    ce = jnp.mean(bce)
    fc = ALPHA * (1.0 - jnp.exp(-ce)) ** GAMMA * ce
    return (score + fc) / 2.0


if __name__ == "__main__":
    key = jax.random.PRNGKey(0)
    k1, k2 = jax.random.split(key)
    N, C, H, W = 2, 4, 16, 16
    logits = jax.random.normal(k1, (N, C, H, W), dtype=jnp.float32)
    targets = jax.random.bernoulli(k2, 0.5, (N, C, H, W)).astype(jnp.float32)

    loss = soft_dice_loss(logits, targets)
    loss = jax.block_until_ready(loss)

    ref = _reference(logits, targets)
    assert jnp.allclose(loss, ref, rtol=1e-5, atol=1e-5), (loss, ref)

    print("KERNEL_OK")
</pallas_src>

<mosaic_0001>
module attributes {stable_mosaic.version = 11 : i64} {
  func.func @_partials_kernel(%arg0: i32, %arg1: i32, %arg2: memref<2x1024xf32, #tpu.memory_space<vmem>>, %arg3: memref<2x1024xf32, #tpu.memory_space<vmem>>, %arg4: memref<2x128xf32, #tpu.memory_space<vmem>>, %arg5: memref<2x128xf32, #tpu.memory_space<vmem>>, %arg6: memref<2x128xf32, #tpu.memory_space<vmem>>, %arg7: memref<2x128xf32, #tpu.memory_space<vmem>>) attributes {dimension_semantics = [#tpu.dimension_semantics<parallel>, #tpu.dimension_semantics<arbitrary>], iteration_bounds = array<i64: 1, 1>, scalar_prefetch = 0 : i64, scratch_operands = 0 : i64, tpu.core_type = #tpu.core_type<tc>, window_params = [{transform_indices = @transform_0, window_bounds = array<i64: 2, 1024>}, {transform_indices = @transform_1, window_bounds = array<i64: 2, 1024>}, {transform_indices = @transform_2, window_bounds = array<i64: 2, 128>}, {transform_indices = @transform_3, window_bounds = array<i64: 2, 128>}, {transform_indices = @transform_4, window_bounds = array<i64: 2, 128>}, {transform_indices = @transform_5, window_bounds = array<i64: 2, 128>}]} {
    %c0_i32 = arith.constant 0 : i32
    %0 = arith.cmpi eq, %arg1, %c0_i32 : i32
    %1 = arith.extui %0 : i1 to i32
    %c0_i32_0 = arith.constant 0 : i32
    %2 = arith.cmpi ne, %1, %c0_i32_0 : i32
    scf.if %2 {
      %cst_30 = arith.constant 0.000000e+00 : f32
      %128 = vector.broadcast %cst_30 : f32 to vector<2x128xf32>
      %c0_31 = arith.constant 0 : index
      %c0_32 = arith.constant 0 : index
      %129 = vector.load %arg4[%c0_31, %c0_32] : memref<2x128xf32, #tpu.memory_space<vmem>>, vector<2x128xf32>
      tpu.vector_store %arg4[%c0_31, %c0_32], %128 {strides = array<i32>} : memref<2x128xf32, #tpu.memory_space<vmem>>, vector<2x128xf32>,
      %cst_33 = arith.constant 0.000000e+00 : f32
      %130 = vector.broadcast %cst_33 : f32 to vector<2x128xf32>
      %c0_34 = arith.constant 0 : index
      %c0_35 = arith.constant 0 : index
      %131 = vector.load %arg5[%c0_34, %c0_35] : memref<2x128xf32, #tpu.memory_space<vmem>>, vector<2x128xf32>
      tpu.vector_store %arg5[%c0_34, %c0_35], %130 {strides = array<i32>} : memref<2x128xf32, #tpu.memory_space<vmem>>, vector<2x128xf32>,
      %cst_36 = arith.constant 0.000000e+00 : f32
      %132 = vector.broadcast %cst_36 : f32 to vector<2x128xf32>
      %c0_37 = arith.constant 0 : index
      %c0_38 = arith.constant 0 : index
      %133 = vector.load %arg6[%c0_37, %c0_38] : memref<2x128xf32, #tpu.memory_space<vmem>>, vector<2x128xf32>
      tpu.vector_store %arg6[%c0_37, %c0_38], %132 {strides = array<i32>} : memref<2x128xf32, #tpu.memory_space<vmem>>, vector<2x128xf32>,
      %cst_39 = arith.constant 0.000000e+00 : f32
      %134 = vector.broadcast %cst_39 : f32 to vector<2x128xf32>
      %c0_40 = arith.constant 0 : index
      %c0_41 = arith.constant 0 : index
      %135 = vector.load %arg7[%c0_40, %c0_41] : memref<2x128xf32, #tpu.memory_space<vmem>>, vector<2x128xf32>
      tpu.vector_store %arg7[%c0_40, %c0_41], %134 {strides = array<i32>} : memref<2x128xf32, #tpu.memory_space<vmem>>, vector<2x128xf32>,
    } else {
    }
    %cst = arith.constant 0.000000e+00 : f32
    %3 = vector.broadcast %cst : f32 to vector<2x128xf32>
    %c0_i32_1 = arith.constant 0 : i32
    %c512_i32 = arith.constant 512 : i32
    %4 = arith.muli %c0_i32_1, %c512_i32 : i32
    %5 = tpu.assume_multiple %4, 512 : i32
    %c0 = arith.constant 0 : index
    %6 = arith.index_cast %5 : i32 to index
    %7 = vector.load %arg2[%c0, %6] : memref<2x1024xf32, #tpu.memory_space<vmem>>, vector<2x512xf32>
    %c0_2 = arith.constant 0 : index
    %8 = arith.index_cast %5 : i32 to index
    %9 = vector.load %arg3[%c0_2, %8] : memref<2x1024xf32, #tpu.memory_space<vmem>>, vector<2x512xf32>
    %10 = math.absf %7 : vector<2x512xf32>
    %cst_3 = arith.constant 0.000000e+00 : f32
    %11 = vector.broadcast %cst_3 : f32 to vector<2x512xf32>
    %12 = arith.subf %11, %10 : vector<2x512xf32>
    %13 = math.exp %12 : vector<2x512xf32>
    %cst_4 = arith.constant 1.000000e+00 : f32
    %14 = vector.broadcast %cst_4 : f32 to vector<2x512xf32>
    %15 = arith.addf %14, %13 : vector<2x512xf32>
    %16 = tpu.reciprocal %15 : vector<2x512xf32> -> vector<2x512xf32>
    %cst_5 = arith.constant 0.000000e+00 : f32
    %17 = vector.broadcast %cst_5 : f32 to vector<2x512xf32>
    %18 = arith.cmpf oge, %7, %17 : vector<2x512xf32>
    %19 = arith.mulf %13, %16 : vector<2x512xf32>
    %20 = arith.select %18, %16, %19 : vector<2x512xi1>, vector<2x512xf32>
    %cst_6 = arith.constant 0.000000e+00 : f32
    %21 = vector.broadcast %cst_6 : f32 to vector<2x512xf32>
    %22 = arith.maximumf %7, %21 : vector<2x512xf32>
    %23 = arith.mulf %7, %9 : vector<2x512xf32>
    %24 = arith.subf %22, %23 : vector<2x512xf32>
    %25 = math.log1p %13 : vector<2x512xf32>
    %26 = arith.addf %24, %25 : vector<2x512xf32>
    %27 = arith.mulf %20, %9 : vector<2x512xf32>
    %28 = vector.extract_strided_slice %27 {offsets = [0, 0], sizes = [2, 128], strides = [1, 1]} : vector<2x512xf32> to vector<2x128xf32>
    %29 = vector.extract_strided_slice %27 {offsets = [0, 128], sizes = [2, 128], strides = [1, 1]} : vector<2x512xf32> to vector<2x128xf32>
    %30 = vector.extract_strided_slice %27 {offsets = [0, 256], sizes = [2, 128], strides = [1, 1]} : vector<2x512xf32> to vector<2x128xf32>
    %31 = vector.extract_strided_slice %27 {offsets = [0, 384], sizes = [2, 128], strides = [1, 1]} : vector<2x512xf32> to vector<2x128xf32>
    %32 = arith.addf %28, %29 : vector<2x128xf32>
    %33 = arith.addf %30, %31 : vector<2x128xf32>
    %34 = arith.addf %32, %33 : vector<2x128xf32>
    %35 = arith.addf %3, %34 : vector<2x128xf32>
    %36 = vector.extract_strided_slice %20 {offsets = [0, 0], sizes = [2, 128], strides = [1, 1]} : vector<2x512xf32> to vector<2x128xf32>
    %37 = vector.extract_strided_slice %20 {offsets = [0, 128], sizes = [2, 128], strides = [1, 1]} : vector<2x512xf32> to vector<2x128xf32>
    %38 = vector.extract_strided_slice %20 {offsets = [0, 256], sizes = [2, 128], strides = [1, 1]} : vector<2x512xf32> to vector<2x128xf32>
    %39 = vector.extract_strided_slice %20 {offsets = [0, 384], sizes = [2, 128], strides = [1, 1]} : vector<2x512xf32> to vector<2x128xf32>
    %40 = arith.addf %36, %37 : vector<2x128xf32>
    %41 = arith.addf %38, %39 : vector<2x128xf32>
    %42 = arith.addf %40, %41 : vector<2x128xf32>
    %43 = arith.addf %3, %42 : vector<2x128xf32>
    %44 = vector.extract_strided_slice %9 {offsets = [0, 0], sizes = [2, 128], strides = [1, 1]} : vector<2x512xf32> to vector<2x128xf32>
    %45 = vector.extract_strided_slice %9 {offsets = [0, 128], sizes = [2, 128], strides = [1, 1]} : vector<2x512xf32> to vector<2x128xf32>
    %46 = vector.extract_strided_slice %9 {offsets = [0, 256], sizes = [2, 128], strides = [1, 1]} : vector<2x512xf32> to vector<2x128xf32>
    %47 = vector.extract_strided_slice %9 {offsets = [0, 384], sizes = [2, 128], strides = [1, 1]} : vector<2x512xf32> to vector<2x128xf32>
    %48 = arith.addf %44, %45 : vector<2x128xf32>
    %49 = arith.addf %46, %47 : vector<2x128xf32>
    %50 = arith.addf %48, %49 : vector<2x128xf32>
    %51 = arith.addf %3, %50 : vector<2x128xf32>
    %52 = vector.extract_strided_slice %26 {offsets = [0, 0], sizes = [2, 128], strides = [1, 1]} : vector<2x512xf32> to vector<2x128xf32>
    %53 = vector.extract_strided_slice %26 {offsets = [0, 128], sizes = [2, 128], strides = [1, 1]} : vector<2x512xf32> to vector<2x128xf32>
    %54 = vector.extract_strided_slice %26 {offsets = [0, 256], sizes = [2, 128], strides = [1, 1]} : vector<2x512xf32> to vector<2x128xf32>
    %55 = vector.extract_strided_slice %26 {offsets = [0, 384], sizes = [2, 128], strides = [1, 1]} : vector<2x512xf32> to vector<2x128xf32>
    %56 = arith.addf %52, %53 : vector<2x128xf32>
    %57 = arith.addf %54, %55 : vector<2x128xf32>
    %58 = arith.addf %56, %57 : vector<2x128xf32>
    %59 = arith.addf %3, %58 : vector<2x128xf32>
    %c1_i32 = arith.constant 1 : i32
    %c512_i32_7 = arith.constant 512 : i32
    %60 = arith.muli %c1_i32, %c512_i32_7 : i32
    %61 = tpu.assume_multiple %60, 512 : i32
    %c0_8 = arith.constant 0 : index
    %62 = arith.index_cast %61 : i32 to index
    %63 = vector.load %arg2[%c0_8, %62] : memref<2x1024xf32, #tpu.memory_space<vmem>>, vector<2x512xf32>
    %c0_9 = arith.constant 0 : index
    %64 = arith.index_cast %61 : i32 to index
    %65 = vector.load %arg3[%c0_9, %64] : memref<2x1024xf32, #tpu.memory_space<vmem>>, vector<2x512xf32>
    %66 = math.absf %63 : vector<2x512xf32>
    %cst_10 = arith.constant 0.000000e+00 : f32
    %67 = vector.broadcast %cst_10 : f32 to vector<2x512xf32>
    %68 = arith.subf %67, %66 : vector<2x512xf32>
    %69 = math.exp %68 : vector<2x512xf32>
    %cst_11 = arith.constant 1.000000e+00 : f32
    %70 = vector.broadcast %cst_11 : f32 to vector<2x512xf32>
    %71 = arith.addf %70, %69 : vector<2x512xf32>
    %72 = tpu.reciprocal %71 : vector<2x512xf32> -> vector<2x512xf32>
    %cst_12 = arith.constant 0.000000e+00 : f32
    %73 = vector.broadcast %cst_12 : f32 to vector<2x512xf32>
    %74 = arith.cmpf oge, %63, %73 : vector<2x512xf32>
    %75 = arith.mulf %69, %72 : vector<2x512xf32>
    %76 = arith.select %74, %72, %75 : vector<2x512xi1>, vector<2x512xf32>
    %cst_13 = arith.constant 0.000000e+00 : f32
    %77 = vector.broadcast %cst_13 : f32 to vector<2x512xf32>
    %78 = arith.maximumf %63, %77 : vector<2x512xf32>
    %79 = arith.mulf %63, %65 : vector<2x512xf32>
    %80 = arith.subf %78, %79 : vector<2x512xf32>
    %81 = math.log1p %69 : vector<2x512xf32>
    %82 = arith.addf %80, %81 : vector<2x512xf32>
    %83 = arith.mulf %76, %65 : vector<2x512xf32>
    %84 = vector.extract_strided_slice %83 {offsets = [0, 0], sizes = [2, 128], strides = [1, 1]} : vector<2x512xf32> to vector<2x128xf32>
    %85 = vector.extract_strided_slice %83 {offsets = [0, 128], sizes = [2, 128], strides = [1, 1]} : vector<2x512xf32> to vector<2x128xf32>
    %86 = vector.extract_strided_slice %83 {offsets = [0, 256], sizes = [2, 128], strides = [1, 1]} : vector<2x512xf32> to vector<2x128xf32>
    %87 = vector.extract_strided_slice %83 {offsets = [0, 384], sizes = [2, 128], strides = [1, 1]} : vector<2x512xf32> to vector<2x128xf32>
    %88 = arith.addf %84, %85 : vector<2x128xf32>
    %89 = arith.addf %86, %87 : vector<2x128xf32>
    %90 = arith.addf %88, %89 : vector<2x128xf32>
    %91 = arith.addf %35, %90 : vector<2x128xf32>
    %92 = vector.extract_strided_slice %76 {offsets = [0, 0], sizes = [2, 128], strides = [1, 1]} : vector<2x512xf32> to vector<2x128xf32>
    %93 = vector.extract_strided_slice %76 {offsets = [0, 128], sizes = [2, 128], strides = [1, 1]} : vector<2x512xf32> to vector<2x128xf32>
    %94 = vector.extract_strided_slice %76 {offsets = [0, 256], sizes = [2, 128], strides = [1, 1]} : vector<2x512xf32> to vector<2x128xf32>
    %95 = vector.extract_strided_slice %76 {offsets = [0, 384], sizes = [2, 128], strides = [1, 1]} : vector<2x512xf32> to vector<2x128xf32>
    %96 = arith.addf %92, %93 : vector<2x128xf32>
    %97 = arith.addf %94, %95 : vector<2x128xf32>
    %98 = arith.addf %96, %97 : vector<2x128xf32>
    %99 = arith.addf %43, %98 : vector<2x128xf32>
    %100 = vector.extract_strided_slice %65 {offsets = [0, 0], sizes = [2, 128], strides = [1, 1]} : vector<2x512xf32> to vector<2x128xf32>
    %101 = vector.extract_strided_slice %65 {offsets = [0, 128], sizes = [2, 128], strides = [1, 1]} : vector<2x512xf32> to vector<2x128xf32>
    %102 = vector.extract_strided_slice %65 {offsets = [0, 256], sizes = [2, 128], strides = [1, 1]} : vector<2x512xf32> to vector<2x128xf32>
    %103 = vector.extract_strided_slice %65 {offsets = [0, 384], sizes = [2, 128], strides = [1, 1]} : vector<2x512xf32> to vector<2x128xf32>
    %104 = arith.addf %100, %101 : vector<2x128xf32>
    %105 = arith.addf %102, %103 : vector<2x128xf32>
    %106 = arith.addf %104, %105 : vector<2x128xf32>
    %107 = arith.addf %51, %106 : vector<2x128xf32>
    %108 = vector.extract_strided_slice %82 {offsets = [0, 0], sizes = [2, 128], strides = [1, 1]} : vector<2x512xf32> to vector<2x128xf32>
    %109 = vector.extract_strided_slice %82 {offsets = [0, 128], sizes = [2, 128], strides = [1, 1]} : vector<2x512xf32> to vector<2x128xf32>
    %110 = vector.extract_strided_slice %82 {offsets = [0, 256], sizes = [2, 128], strides = [1, 1]} : vector<2x512xf32> to vector<2x128xf32>
    %111 = vector.extract_strided_slice %82 {offsets = [0, 384], sizes = [2, 128], strides = [1, 1]} : vector<2x512xf32> to vector<2x128xf32>
    %112 = arith.addf %108, %109 : vector<2x128xf32>
    %113 = arith.addf %110, %111 : vector<2x128xf32>
    %114 = arith.addf %112, %113 : vector<2x128xf32>
    %115 = arith.addf %59, %114 : vector<2x128xf32>
    %c2_i32 = arith.constant 2 : i32
    %c0_14 = arith.constant 0 : index
    %c0_15 = arith.constant 0 : index
    %116 = vector.load %arg4[%c0_14, %c0_15] : memref<2x128xf32, #tpu.memory_space<vmem>>, vector<2x128xf32>
    %117 = arith.addf %116, %91 : vector<2x128xf32>
    %c0_16 = arith.constant 0 : index
    %c0_17 = arith.constant 0 : index
    %118 = vector.load %arg4[%c0_16, %c0_17] : memref<2x128xf32, #tpu.memory_space<vmem>>, vector<2x128xf32>
    tpu.vector_store %arg4[%c0_16, %c0_17], %117 {strides = array<i32>} : memref<2x128xf32, #tpu.memory_space<vmem>>, vector<2x128xf32>,
    %c0_18 = arith.constant 0 : index
    %c0_19 = arith.constant 0 : index
    %119 = vector.load %arg5[%c0_18, %c0_19] : memref<2x128xf32, #tpu.memory_space<vmem>>, vector<2x128xf32>
    %120 = arith.addf %119, %99 : vector<2x128xf32>
    %c0_20 = arith.constant 0 : index
    %c0_21 = arith.constant 0 : index
    %121 = vector.load %arg5[%c0_20, %c0_21] : memref<2x128xf32, #tpu.memory_space<vmem>>, vector<2x128xf32>
    tpu.vector_store %arg5[%c0_20, %c0_21], %120 {strides = array<i32>} : memref<2x128xf32, #tpu.memory_space<vmem>>, vector<2x128xf32>,
    %c0_22 = arith.constant 0 : index
    %c0_23 = arith.constant 0 : index
    %122 = vector.load %arg6[%c0_22, %c0_23] : memref<2x128xf32, #tpu.memory_space<vmem>>, vector<2x128xf32>
    %123 = arith.addf %122, %107 : vector<2x128xf32>
    %c0_24 = arith.constant 0 : index
    %c0_25 = arith.constant 0 : index
    %124 = vector.load %arg6[%c0_24, %c0_25] : memref<2x128xf32, #tpu.memory_space<vmem>>, vector<2x128xf32>
    tpu.vector_store %arg6[%c0_24, %c0_25], %123 {strides = array<i32>} : memref<2x128xf32, #tpu.memory_space<vmem>>, vector<2x128xf32>,
    %c0_26 = arith.constant 0 : index
    %c0_27 = arith.constant 0 : index
    %125 = vector.load %arg7[%c0_26, %c0_27] : memref<2x128xf32, #tpu.memory_space<vmem>>, vector<2x128xf32>
    %126 = arith.addf %125, %115 : vector<2x128xf32>
    %c0_28 = arith.constant 0 : index
    %c0_29 = arith.constant 0 : index
    %127 = vector.load %arg7[%c0_28, %c0_29] : memref<2x128xf32, #tpu.memory_space<vmem>>, vector<2x128xf32>
    tpu.vector_store %arg7[%c0_28, %c0_29], %126 {strides = array<i32>} : memref<2x128xf32, #tpu.memory_space<vmem>>, vector<2x128xf32>,
    return
  }
  func.func @transform_0(%arg0: i32, %arg1: i32) -> (i32, i32) {
    %c0_i32 = arith.constant 0 : i32
    return %arg0, %arg1 : i32, i32
  }
  func.func @transform_1(%arg0: i32, %arg1: i32) -> (i32, i32) {
    %c0_i32 = arith.constant 0 : i32
    return %arg0, %arg1 : i32, i32
  }
  func.func @transform_2(%arg0: i32, %arg1: i32) -> (i32, i32) {
    %c0_i32 = arith.constant 0 : i32
    %c0_i32_0 = arith.constant 0 : i32
    return %arg0, %c0_i32 : i32, i32
  }
  func.func @transform_3(%arg0: i32, %arg1: i32) -> (i32, i32) {
    %c0_i32 = arith.constant 0 : i32
    %c0_i32_0 = arith.constant 0 : i32
    return %arg0, %c0_i32 : i32, i32
  }
  func.func @transform_4(%arg0: i32, %arg1: i32) -> (i32, i32) {
    %c0_i32 = arith.constant 0 : i32
    %c0_i32_0 = arith.constant 0 : i32
    return %arg0, %c0_i32 : i32, i32
  }
  func.func @transform_5(%arg0: i32, %arg1: i32) -> (i32, i32) {
    %c0_i32 = arith.constant 0 : i32
    %c0_i32_0 = arith.constant 0 : i32
    return %arg0, %c0_i32 : i32, i32
  }
}

</mosaic_0001>

<bundles_post_ra>
// kernel: soft_dice_loss.1
= control target key start
LH: loop header
LB: loop body
LE: loop exit
PB: predicated region body
PF: predicated region fallthrough
CT: control target
= control target key end

     0   :  { %v232_v0 = vmov 0.0   ;;  %s372_s2 = inlined_call_operand.vmem [shape: f32[2,128], index: 2, kind: output, shape index: {0}]   ;;  %s373_s3 = inlined_call_operand.vmem [shape: f32[2,128], index: 3, kind: output, shape index: {1}]   ;;  %s374_s4 = inlined_call_operand.vmem [shape: f32[2,128], index: 4, kind: output, shape index: {2}]   ;;  %s375_s0 = inlined_call_operand.vmem [shape: f32[2,1024], index: 0, kind: input, shape index: {}]   ;;  %s376_s5 = inlined_call_operand.vmem [shape: f32[2,128], index: 5, kind: output, shape index: {3}]   ;;  %s377_s1 = inlined_call_operand.vmem [shape: f32[2,1024], index: 1, kind: input, shape index: {}]  }
   0x1   :  { %19 = vst [vmem:[%s372_s2] sm:$0x3] %v232_v0  ;;  %v269_v1 = vld [vmem:[%s375_s0] sm:$0xff]  ;;  %v274_v2 = vld [vmem:[%s375_s0 + $0x8] sm:$0xff] }
   0x2   :  { %20 = vst [vmem:[%s373_s3] sm:$0x3] %v232_v0  ;;  %v25_v3 = vand.u32 2147483647, %v269_v1  ;;  %v109_v4 = vand.u32 2147483647, %v274_v2  ;;  %v290_v9 = vld [vmem:[%s377_s1] sm:$0xff] }
   0x3   :  { %21 = vst [vmem:[%s374_s4] sm:$0x3] %v232_v0  ;;  %v295_v10 = vld [vmem:[%s377_s1 + $0x8] sm:$0xff]  ;;  %v84_v11 = vrot.slane %v290_v9, 2  ;;  %v87_v12 = vrot.slane %v290_v9, 4  ;;  %v89_v13 = vrot.slane %v290_v9, 6  ;;  %v47_v32 = vmax.f32 %v269_v1, 0.0 }
   0x4   :  { %22 = vst [vmem:[%s376_s5] sm:$0x3] %v232_v0  ;;  %v26_v5 = vsub.f32 0.0, %v25_v3  ;;  %v110_v6 = vsub.f32 0.0, %v109_v4  ;;  %v168_v14 = vrot.slane %v295_v10, 2  ;;  %v171_v15 = vrot.slane %v295_v10, 4 }
   0x5   :  { %v173_v16 = vrot.slane %v295_v10, 6  ;;  %v86_v17 = vadd.f32 %v84_v11, %v290_v9  ;;  %v91_v18 = vadd.f32 %v89_v13, %v87_v12  ;;  %v48_v33 = vmul.f32 %v290_v9, %v269_v1 }
   0x6   :  { %v27_v7 = vmul.f32 1.442695, %v26_v5  ;;  %v111_v8 = vmul.f32 1.442695, %v110_v6  ;;  %v170_v19 = vadd.f32 %v295_v10, %v168_v14  ;;  %v131_v36 = vmax.f32 %v274_v2, 0.0 }
   0x7   :  { %v175_v20 = vadd.f32 %v173_v16, %v171_v15  ;;  %v92_v21 = vadd.f32 %v91_v18, %v86_v17  ;;  %v49_v39 = vsub.f32 %v47_v32, %v48_v33  ;;  %v132_v40 = vmul.f32 %v295_v10, %v274_v2 }
   0x8   :  { %220 = vpow2.f32 %v27_v7  ;;  %vm44_vm10 = vcmp.ge.f32.partialorder %v269_v1, 0.0  ;;  %vm128_vm11 = vcmp.ge.f32.partialorder %v274_v2, 0.0 }
   0x9   :  { %222 = vpow2.f32 %v111_v8  ;;  %v176_v23 = vadd.f32 %v175_v20, %v170_v19  ;;  %v133_v60 = vsub.f32 %v131_v36, %v132_v40 }
   0xa   :  { %v195_v28 = vld [vmem:[%s374_s4] sm:$0x3] }
   0xb   :  { %v177_v27 = vadd.f32 %v176_v23, %v92_v21 }
   0xd   :  { %v196_v31 = vadd.f32 %v195_v28, %v177_v27 }
   0xe   :  { %v305_v22 = vpop.eup %220 }
   0xf   :  { %v307_v24 = vpop.eup %222  ;;  %v29_v25 = vadd.f32 1.0, %v305_v22  ;;  %v53_v29 = vmul.f32 -0.5, %v305_v22  ;;  %197 = vst [vmem:[%s374_s4] sm:$0x3] %v196_v31  ;;  %v56_v35 = vand.u32 2147483647, %v305_v22 }
  0x10   :  { %v113_v26 = vadd.f32 1.0, %v307_v24  ;;  %v137_v30 = vmul.f32 -0.5, %v307_v24  ;;  %v140_v41 = vand.u32 2147483647, %v307_v24 }
  0x11   :  { %224 = vrcp.f32 %v29_v25  ;;  %v54_v34 = vadd.f32 1.0, %v53_v29  ;;  %vm35_vm0 = vweird.f32 %v29_v25  ;;  %v39_v44 = vand.u32 2147483647, %v29_v25 }
  0x12   :  { %226 = vrcp.f32 %v113_v26  ;;  %v138_v37 = vadd.f32 1.0, %v137_v30  ;;  %v41_v45 = vand.u32 2147483648, %v29_v25  ;;  %v123_v49 = vand.u32 2147483647, %v113_v26 }
  0x13   :  { %228 = vlog2.f32 %v29_v25  ;;  %v55_v46 = vmul.f32 %v305_v22, %v54_v34  ;;  %v125_v50 = vand.u32 2147483648, %v113_v26  ;;  %vm328_vm1 = vcmp.lt.f32.partialorder %v56_v35, 0.0004427343 }
  0x14   :  { %230 = vlog2.f32 %v113_v26  ;;  %v139_v54 = vmul.f32 %v307_v24, %v138_v37  ;;  %vm119_vm3 = vweird.f32 %v113_v26  ;;  %vm333_vm5 = vcmp.lt.f32.partialorder %v140_v41, 0.0004427343 }
  0x15   :  { %vm40_vm7 = vcmp.eq.f32.partialorder %v39_v44, 8.507059e+37  ;;  %v42_v63 = vor.u32 1.1754944e-38, %v41_v45  ;;  %vm124_vm9 = vcmp.eq.f32.partialorder %v123_v49, 8.507059e+37  ;;  %v126_v5 = vor.u32 1.1754944e-38, %v125_v50 }
  0x17   :  { %v225_v38 = vpop.eup %224 }
  0x18   :  { %v227_v42 = vpop.eup %226  ;;  %v31_v43 = vmul.f32 %v225_v38, %v29_v25  ;;  %vm36_vm2 = vweird.f32 %v225_v38 }
  0x19   :  { %v229_v47 = vpop.eup %228  ;;  %v115_v48 = vmul.f32 %v227_v42, %v113_v26  ;;  %vm120_vm4 = vweird.f32 %v227_v42  ;;  %vm340_vm6 = vmor %vm35_vm0, %vm36_vm2 }
  0x1a   :  { %v32_v52 = vsub.f32 1.0, %v31_v43  ;;  %v52_v53 = vmul.f32 0.6931472, %v229_v47  ;;  %v231_v55 = vpop.eup %230  ;;  %vm121_vm8 = vmor %vm119_vm3, %vm120_vm4 }
  0x1b   :  { %v116_v56 = vsub.f32 1.0, %v115_v48  ;;  %v136_v61 = vmul.f32 0.6931472, %v231_v55 }
  0x1c   :  { %v33_v58 = vmul.f32 %v225_v38, %v32_v52  ;;  %v58_v59 = vsel %vm328_vm1, %v55_v46, %v52_v53  ;;  %v189_v52 = vld [vmem:[%s372_s2] sm:$0x3] }
  0x1d   :  { %v117_v0 = vmul.f32 %v227_v42, %v116_v56  ;;  %v59_v3 = vadd.f32 %v58_v59, %v49_v39  ;;  %v142_v6 = vsel %vm333_vm5, %v139_v54, %v136_v61  ;;  %v198_v54 = vld [vmem:[%s376_s5] sm:$0x3] }
  0x1e   :  { %v34_v4 = vadd.f32 %v225_v38, %v33_v58  ;;  %v143_v14 = vadd.f32 %v142_v6, %v133_v60  ;;  %v192_v56 = vld [vmem:[%s373_s3] sm:$0x3] }
  0x1f   :  { %v118_v7 = vadd.f32 %v227_v42, %v117_v0  ;;  %v95_v8 = vrot.slane %v59_v3, 2  ;;  %v98_v11 = vrot.slane %v59_v3, 4  ;;  %v100_v12 = vrot.slane %v59_v3, 6 }
  0x20   :  { %v38_v13 = vsel %vm340_vm6, %v225_v38, %v34_v4  ;;  %v179_v19 = vrot.slane %v143_v14, 2  ;;  %v182_v27 = vrot.slane %v143_v14, 4  ;;  %v184_v28 = vrot.slane %v143_v14, 6 }
  0x21   :  { %v43_v15 = vsel %vm40_vm7, %v42_v63, %v38_v13  ;;  %v122_v16 = vsel %vm121_vm8, %v227_v42, %v118_v7  ;;  %v97_v21 = vadd.f32 %v95_v8, %v59_v3  ;;  %v102_v23 = vadd.f32 %v100_v12, %v98_v11 }
  0x22   :  { %v45_v17 = vmul.f32 %v305_v22, %v43_v15  ;;  %v127_v18 = vsel %vm124_vm9, %v126_v5, %v122_v16  ;;  %v181_v26 = vadd.f32 %v179_v19, %v143_v14  ;;  %v186_v47 = vadd.f32 %v184_v28, %v182_v27 }
  0x23   :  { %v129_v20 = vmul.f32 %v307_v24, %v127_v18  ;;  %v103_v46 = vadd.f32 %v102_v23, %v97_v21 }
  0x24   :  { %v46_v25 = vsel %vm44_vm10, %v43_v15, %v45_v17  ;;  %v187_v51 = vadd.f32 %v186_v47, %v181_v26 }
  0x25   :  { %v60_v29 = vmul.f32 %v46_v25, %v290_v9  ;;  %v130_v30 = vsel %vm128_vm11, %v127_v18, %v129_v20  ;;  %v73_v31 = vrot.slane %v46_v25, 2  ;;  %v76_v1 = vrot.slane %v46_v25, 4 }
  0x26   :  { %v144_v32 = vmul.f32 %v295_v10, %v130_v30  ;;  %v78_v22 = vrot.slane %v46_v25, 6  ;;  %v157_v33 = vrot.slane %v130_v30, 2  ;;  %v160_v34 = vrot.slane %v130_v30, 4 }
  0x27   :  { %v62_v2 = vrot.slane %v60_v29, 2  ;;  %v65_v35 = vrot.slane %v60_v29, 4  ;;  %v67_v36 = vrot.slane %v60_v29, 6  ;;  %v75_v24 = vadd.f32 %v73_v31, %v46_v25 }
  0x28   :  { %v146_v37 = vrot.slane %v144_v32, 2  ;;  %v149_v38 = vrot.slane %v144_v32, 4  ;;  %v151_v39 = vrot.slane %v144_v32, 6  ;;  %v80_v40 = vadd.f32 %v78_v22, %v76_v1 }
  0x29   :  { %v64_v41 = vadd.f32 %v62_v2, %v60_v29  ;;  %v69_v42 = vadd.f32 %v67_v36, %v65_v35  ;;  %v159_v43 = vadd.f32 %v157_v33, %v130_v30  ;;  %v162_v9 = vrot.slane %v130_v30, 6 }
  0x2a   :  { %v148_v44 = vadd.f32 %v146_v37, %v144_v32  ;;  %v153_v45 = vadd.f32 %v151_v39, %v149_v38  ;;  %v81_v48 = vadd.f32 %v80_v40, %v75_v24  ;;  %v188_v57 = vadd.f32 %v187_v51, %v103_v46 }
  0x2b   :  { %v70_v10 = vadd.f32 %v69_v42, %v64_v41  ;;  %v164_v49 = vadd.f32 %v162_v9, %v160_v34 }
  0x2c   :  { %v154_v50 = vadd.f32 %v153_v45, %v148_v44  ;;  %v199_v60 = vadd.f32 %v198_v54, %v188_v57 }
  0x2d   :  { %v165_v53 = vadd.f32 %v164_v49, %v159_v43 }
  0x2e   :  { %v155_v55 = vadd.f32 %v154_v50, %v70_v10  ;;  %200 = vst [vmem:[%s376_s5] sm:$0x3] %v199_v60 }
  0x2f   :  { %v166_v58 = vadd.f32 %v165_v53, %v81_v48 }
  0x30   :  { %v190_v59 = vadd.f32 %v189_v52, %v155_v55 }
  0x31   :  { %v193_v61 = vadd.f32 %v192_v56, %v166_v58 }
  0x32   :  { %191 = vst [vmem:[%s372_s2] sm:$0x3] %v190_v59 }
  0x33   :  { %194 = vst [vmem:[%s373_s3] sm:$0x3] %v193_v61 }

</bundles_post_ra>
